<compile_context>
chip_gen: v6e
topology: v6e:2x2x1
jax: 0.10.0
libtpu: 0.0.40
codegen_flags: <defaults>
</compile_context>

<pallas_src>
import functools

import jax
import jax.numpy as jnp
from jax.experimental import pallas as pl
from jax.experimental.pallas import tpu as pltpu


_LANES = 128
_VMEM_LIMIT = 32 * 1024 * 1024  # safe on v5e (128 MiB), v6e (128 MiB), v7x (64 MiB)


def _round_up(x, m):
    return ((x + m - 1) // m) * m


# ----------------------------- Pallas kernels -----------------------------

def _binary_kernel(x_ref, y_ref, o_ref, *, op):
    # Cast inside the kernel (VPU) instead of materializing HBM copies.
    x = x_ref[...].astype(o_ref.dtype)
    y = y_ref[...].astype(o_ref.dtype)
    if op == "add":
        o_ref[...] = x + y
    elif op == "mul":
        o_ref[...] = x * y
    else:
        raise ValueError(op)


def _sum_kernel(x_ref, o_ref):
    # Tiled reduction: output block index is constant across the grid axis,
    # so o_ref stays resident in VMEM and acts as the f32 accumulator.
    @pl.when(pl.program_id(0) == 0)
    def _():
        o_ref[...] = jnp.zeros_like(o_ref)

    x = x_ref[...].astype(jnp.float32)
    lane_partial = jnp.sum(x, axis=-1, keepdims=True)              # (TR, 1), XLU
    o_ref[...] = o_ref[...] + jnp.sum(lane_partial, axis=0,
                                      keepdims=True)               # (1, 1)


def _matmul_kernel_f32(a_ref, b_ref, o_ref):
    # f32 output: accumulate directly into the resident output block
    # (index_map ignores the K axis), no extra (tm, tn) scratch.
    @pl.when(pl.program_id(2) == 0)
    def _():
        o_ref[...] = jnp.zeros_like(o_ref)

    o_ref[...] += jnp.dot(a_ref[...], b_ref[...],
                          preferred_element_type=jnp.float32)


def _matmul_kernel_acc(a_ref, b_ref, o_ref, acc_ref):
    # Narrow output dtypes: accumulate in an f32 scratch, cast once at the end.
    @pl.when(pl.program_id(2) == 0)
    def _():
        acc_ref[...] = jnp.zeros_like(acc_ref)

    acc_ref[...] += jnp.dot(a_ref[...], b_ref[...],
                            preferred_element_type=jnp.float32)

    @pl.when(pl.program_id(2) == pl.num_programs(2) - 1)
    def _():
        o_ref[...] = acc_ref[...].astype(o_ref.dtype)


# ------------------------------ wrappers -----------------------------------

def _to_padded_slab(x, tr):
    """Flatten to a lane-dense 2D slab [rows_p, 128], zero-padding the tail."""
    flat = x.reshape(-1)
    total = flat.shape[0]
    rows = pl.cdiv(total, _LANES)
    rows_p = _round_up(max(rows, 1), tr)
    total_p = rows_p * _LANES
    if total_p != total:
        flat = jnp.pad(flat, (0, total_p - total))
    return flat.reshape(rows_p, _LANES)


def _elementwise_pallas(op, x, y):
    out_dtype = jnp.result_type(x.dtype, y.dtype)
    if y.shape != x.shape:
        # TODO(synk): general torch broadcasting; fall back to a JAX-side
        # broadcast for mismatched shapes (same-shape path stays copy-free).
        y = jnp.broadcast_to(y, x.shape)

    total = x.size
    rows = pl.cdiv(total, _LANES)
    tr = min(1024, _round_up(max(rows, 1), 8))        # <= 512 KiB per f32 buffer
    xs = _to_padded_slab(x, tr)
    ys = _to_padded_slab(y, tr)
    rows_p = xs.shape[0]

    out = pl.pallas_call(
        functools.partial(_binary_kernel, op=op),
        out_shape=jax.ShapeDtypeStruct((rows_p, _LANES), out_dtype),
        grid=(rows_p // tr,),
        in_specs=[pl.BlockSpec((tr, _LANES), lambda i: (i, 0)),
                  pl.BlockSpec((tr, _LANES), lambda i: (i, 0))],
        out_specs=pl.BlockSpec((tr, _LANES), lambda i: (i, 0)),
        compiler_params=pltpu.CompilerParams(
            dimension_semantics=("parallel",),
            vmem_limit_bytes=_VMEM_LIMIT),
    )(xs, ys)
    return out.reshape(-1)[:total].reshape(x.shape).astype(out_dtype)


def _sum_pallas(x):
    total = x.size
    rows = pl.cdiv(total, _LANES)
    tr = min(1024, _round_up(max(rows, 1), 8))
    xs = _to_padded_slab(x, tr)                       # zero padding -> sum unchanged
    rows_p = xs.shape[0]

    out = pl.pallas_call(
        _sum_kernel,
        out_shape=jax.ShapeDtypeStruct((1, 1), jnp.float32),
        grid=(rows_p // tr,),
        in_specs=[pl.BlockSpec((tr, _LANES), lambda i: (i, 0))],
        out_specs=pl.BlockSpec((1, 1), lambda i: (0, 0)),
        compiler_params=pltpu.CompilerParams(
            dimension_semantics=("arbitrary",),
            vmem_limit_bytes=_VMEM_LIMIT),
    )(xs)
    return out.reshape(())  # torch.Tensor.sum() returns a 0-d scalar


def _matmul_pallas(a, b):
    M, K = a.shape
    K2, N = b.shape
    assert K == K2
    out_dtype = jnp.result_type(a.dtype, b.dtype)

    # Tile sizes: lane-dense K (>=128), MXU-friendly M/N, capped so that the
    # double-buffered working set fits comfortably on v5e/v6e/v7x VMEM.
    tm = min(256, _round_up(M, 8))
    tn = min(256, _round_up(N, _LANES))
    tk = min(512, _round_up(K, _LANES))

    Mp, Kp, Np = _round_up(M, tm), _round_up(K, tk), _round_up(N, tn)
    a_p = a if (Mp == M and Kp == K) else jnp.pad(a, ((0, Mp - M), (0, Kp - K)))
    b_p = b if (Kp == K and Np == N) else jnp.pad(b, ((0, Kp - K), (0, Np - N)))

    grid = (Mp // tm, Np // tn, Kp // tk)
    in_specs = [pl.BlockSpec((tm, tk), lambda i, j, k: (i, k)),
                pl.BlockSpec((tk, tn), lambda i, j, k: (k, j))]
    out_specs = pl.BlockSpec((tm, tn), lambda i, j, k: (i, j))
    cparams = pltpu.CompilerParams(
        dimension_semantics=("parallel", "parallel", "arbitrary"),
        vmem_limit_bytes=_VMEM_LIMIT)

    if out_dtype == jnp.float32:
        out = pl.pallas_call(
            _matmul_kernel_f32,
            out_shape=jax.ShapeDtypeStruct((Mp, Np), out_dtype),
            grid=grid, in_specs=in_specs, out_specs=out_specs,
            compiler_params=cparams,
        )(a_p, b_p)
    else:
        out = pl.pallas_call(
            _matmul_kernel_acc,
            out_shape=jax.ShapeDtypeStruct((Mp, Np), out_dtype),
            grid=grid, in_specs=in_specs, out_specs=out_specs,
            scratch_shapes=[pltpu.VMEM((tm, tn), jnp.float32)],
            compiler_params=cparams,
        )(a_p, b_p)

    return out[:M, :N]


class TensorOPTemplate:
    """JAX/Pallas analogue of the PyTorch TensorOPTemplate dispatcher."""

    _DISPATCH = {
        "add": lambda *args: _elementwise_pallas("add", *args),
        "mul": lambda *args: _elementwise_pallas("mul", *args),
        "matmul": lambda *args: _matmul_pallas(*args),
        "sum": lambda *args: _sum_pallas(*args),
    }
    # TODO(synk): the original module dispatches to *any* torch.Tensor method
    # by name; only the ops above have Pallas kernels here.

    def __init__(self, op_name, hook_inside=False, parall_execute=False):
        self.op_name_ = str(op_name)
        self.prefix_op_name_ = "Tensor_" + self.op_name_ + "_"
        self.changed_status = hook_inside
        self.parall_execute = parall_execute

    def forward(self, *args, **kwargs):
        if self.op_name_ not in self._DISPATCH:
            raise NotImplementedError(self.op_name_)
        # The torch wrapper times the op and prints cost; we keep output quiet
        # per harness requirements (only "KERNEL_OK" on success).
        return self._DISPATCH[self.op_name_](*args, **kwargs)

    __call__ = forward


# ------------------------------ demo / check --------------------------------

if __name__ == "__main__":
    key = jax.random.PRNGKey(0)
    k1, k2, k3, k4 = jax.random.split(key, 4)

    # Elementwise ops on an NCHW-like tensor [2, 4, 16, 16].
    x = jax.random.normal(k1, (2, 4, 16, 16), dtype=jnp.float32)
    y = jax.random.normal(k2, (2, 4, 16, 16), dtype=jnp.float32)

    # Matmul operands: [8, 64] @ [64, 128]
    a = jax.random.normal(k3, (8, 64), dtype=jnp.float32)
    b = jax.random.normal(k4, (64, 128), dtype=jnp.float32)

    add_op = TensorOPTemplate("add", hook_inside=True)
    mul_op = TensorOPTemplate("mul", hook_inside=True)
    mm_op = TensorOPTemplate("matmul", hook_inside=True)
    sum_op = TensorOPTemplate("sum", hook_inside=True)

    out_add = jax.block_until_ready(add_op(x, y))
    out_mul = jax.block_until_ready(mul_op(x, y))
    out_mm = jax.block_until_ready(mm_op(a, b))
    out_sum = jax.block_until_ready(sum_op(x))

    # Correctness checks against plain-JAX references.
    assert jnp.allclose(out_add, x + y, atol=1e-5)
    assert jnp.allclose(out_mul, x * y, atol=1e-5)
    assert jnp.allclose(out_mm, a @ b, atol=1e-3, rtol=1e-3)
    assert jnp.allclose(out_sum, jnp.sum(x), atol=1e-3)
    assert out_add.shape == x.shape and out_mm.shape == (8, 128)
    assert out_sum.shape == ()

    print("KERNEL_OK")
</pallas_src>

<mosaic_0001>
module attributes {stable_mosaic.version = 11 : i64} {
  func.func @_binary_kernel(%arg0: i32, %arg1: memref<16x128xf32, #tpu.memory_space<vmem>>, %arg2: memref<16x128xf32, #tpu.memory_space<vmem>>, %arg3: memref<16x128xf32, #tpu.memory_space<vmem>>) attributes {dimension_semantics = [#tpu.dimension_semantics<parallel>], iteration_bounds = array<i64: 1>, scalar_prefetch = 0 : i64, scratch_operands = 0 : i64, tpu.core_type = #tpu.core_type<tc>, window_params = [{transform_indices = @transform_0, window_bounds = array<i64: 16, 128>}, {transform_indices = @transform_1, window_bounds = array<i64: 16, 128>}, {transform_indices = @transform_2, window_bounds = array<i64: 16, 128>}]} {
    %c0 = arith.constant 0 : index
    %c0_0 = arith.constant 0 : index
    %0 = vector.load %arg1[%c0, %c0_0] : memref<16x128xf32, #tpu.memory_space<vmem>>, vector<16x128xf32>
    %c0_1 = arith.constant 0 : index
    %c0_2 = arith.constant 0 : index
    %1 = vector.load %arg2[%c0_1, %c0_2] : memref<16x128xf32, #tpu.memory_space<vmem>>, vector<16x128xf32>
    %2 = arith.addf %0, %1 : vector<16x128xf32>
    %c0_3 = arith.constant 0 : index
    %c0_4 = arith.constant 0 : index
    %3 = vector.load %arg3[%c0_3, %c0_4] : memref<16x128xf32, #tpu.memory_space<vmem>>, vector<16x128xf32>
    tpu.vector_store %arg3[%c0_3, %c0_4], %2 {strides = array<i32>} : memref<16x128xf32, #tpu.memory_space<vmem>>, vector<16x128xf32>,
    return
  }
  func.func @transform_0(%arg0: i32) -> (i32, i32) {
    %c0_i32 = arith.constant 0 : i32
    %c0_i32_0 = arith.constant 0 : i32
    return %arg0, %c0_i32 : i32, i32
  }
  func.func @transform_1(%arg0: i32) -> (i32, i32) {
    %c0_i32 = arith.constant 0 : i32
    %c0_i32_0 = arith.constant 0 : i32
    return %arg0, %c0_i32 : i32, i32
  }
  func.func @transform_2(%arg0: i32) -> (i32, i32) {
    %c0_i32 = arith.constant 0 : i32
    %c0_i32_0 = arith.constant 0 : i32
    return %arg0, %c0_i32 : i32, i32
  }
}

</mosaic_0001>

<bundles_post_ra>
// kernel: tpu_custom_call.1
= control target key start
LH: loop header
LB: loop body
LE: loop exit
PB: predicated region body
PF: predicated region fallthrough
CT: control target
= control target key end

     0   :  { %7 = vsyncpa [#allocation3], 0  ;;  %s175_s0 = inlined_call_operand.hbm [shape: f32[16,128], index: 0, kind: input, shape index: {}]   ;;  %s176_s1 = inlined_call_operand.hbm [shape: f32[16,128], index: 1, kind: input, shape index: {}]   ;;  %s177_s2 = inlined_call_operand.hbm [shape: f32[16,128], index: 2, kind: output, shape index: {}]  }
   0x1   :  { %8 = vsyncpa [#allocation6], 0 }
   0x2   :  { %9 = vsyncpa [#allocation4], 0  ;;  %s137_s9 = smov [#allocation2]  }
   0x3   :  { %s15_s10 = sshll.u32 %s137_s9, 4  ;;  %s16_s10 = int_to_ptr.vmem [resolvable:$true] %s15_s10 }
   0x4   :  { %s79_s11 = scalar_lea.vmem %s16_s10, 256  ;;  %p84_p1 = scmp.lt.s32.totalorder %s16_s10, %s16_s10 }
   0x5   :  { %p80_p0 = scmp.ne.s32.totalorder %s16_s10, %s79_s11  ;;  %p85_p2 = scmp.lt.s32.totalorder %s79_s11, %s79_s11 }
   0x7   :  { %p86_p3 = por %p85_p2, %p84_p1 }
   0x9   :  { %p87_p4 = pnand %p86_p3, %p80_p0 }
   0xb   :  { %90 = shalt.err (!%p87_p4)
}
   0xc   :  { %s138_s12 = smov 128   ;;  %s139_s13 = smov 8  }
   0xd   :  { %21 = dma.hbm_to_vmem [thread:$0]  %s175_s0, 256, %s16_s10, [#allocation3], %s138_s12, %s138_s12, %s139_s13  }
   0xe   :  { %s140_s16 = smov [#allocation5]  }
   0xf   :  { %s27_s17 = sshll.u32 %s140_s16, 4  ;;  %s28_s17 = int_to_ptr.vmem [resolvable:$true] %s27_s17 }
  0x10   :  { %s99_s18 = scalar_lea.vmem %s28_s17, 256  ;;  %p104_p6 = scmp.lt.s32.totalorder %s28_s17, %s28_s17 }
  0x11   :  { %p100_p5 = scmp.ne.s32.totalorder %s28_s17, %s99_s18  ;;  %p105_p7 = scmp.lt.s32.totalorder %s99_s18, %s99_s18 }
  0x13   :  { %p106_p8 = por %p105_p7, %p104_p6 }
  0x15   :  { %p107_p9 = pnand %p106_p8, %p100_p5 }
  0x17   :  { %110 = shalt.err (!%p107_p9)
}
  0x18   :  { %33 = dma.hbm_to_vmem [thread:$0]  %s176_s1, 256, %s28_s17, [#allocation6], %s138_s12, %s138_s12, %s139_s13  }
  0x19   :  { %131 = dma.done.wait [#allocation3], 256  }
  0x1a   :  { %132 = vsyncadd [#allocation3], 4294967040 }
  0x1b   :  { %133 = dma.done.wait [#allocation6], 256  }
  0x1c   :  { %134 = vsyncadd [#allocation6], 4294967040  ;;  %s141_s0 = smov [#allocation7]   ;;  %v40_v0 = vld [vmem:[#allocation2] sm:$0xff]  ;;  %v42_v1 = vld [vmem:[#allocation5] sm:$0xff] }
  0x1d   :  { %s53_s21 = sshll.u32 %s141_s0, 4  ;;  %v41_v2 = vld [vmem:[#allocation2 + $0x8] sm:$0xff]  ;;  %v44_v3 = vadd.f32 %v42_v1, %v40_v0  ;;  %v43_v4 = vld [vmem:[#allocation5 + $0x8] sm:$0xff]  ;;  %s54_s21 = int_to_ptr.vmem [resolvable:$true] %s53_s21 }
  0x1e   :  { %v45_v5 = vadd.f32 %v43_v4, %v41_v2  ;;  %s111_s22 = scalar_lea.vmem %s54_s21, 256  ;;  %p116_p11 = scmp.lt.s32.totalorder %s54_s21, %s54_s21 }
  0x1f   :  { %46 = vst [vmem:[#allocation7] sm:$0xff] %v44_v3  ;;  %p112_p10 = scmp.ne.s32.totalorder %s54_s21, %s111_s22  ;;  %p117_p12 = scmp.lt.s32.totalorder %s111_s22, %s111_s22 }
  0x20   :  { %47 = vst [vmem:[#allocation7 + $0x8] sm:$0xff] %v45_v5 }
  0x21   :  { %p118_p13 = por %p117_p12, %p116_p11 }
  0x23   :  { %p119_p0 = pnand %p118_p13, %p112_p10 }
  0x25   :  { %122 = shalt.err (!%p119_p0)
}
  0x26   :  { %59 = dma.vmem_to_hbm [thread:$0]  %s54_s21, 256, %s177_s2, [#allocation4], %s138_s12, %s138_s12, %s139_s13  }
  0x27   :  { %135 = dma.done.wait [#allocation4], 256  }
  0x28   :  { %136 = vsyncadd [#allocation4], 4294967040 }
  0x29   :  { %63 = vsyncpa [#allocation3], 1 }
  0x2a   :  { %64 = vsyncpa [#allocation6], 1 }
  0x2b   :  { %65 = vsyncpa [#allocation4], 1 }

</bundles_post_ra>
